<compile_context>
chip_gen: v7x
topology: tpu7x:2x2x1
jax: 0.10.0
libtpu: 0.0.40
codegen_flags: <defaults>
</compile_context>

<pallas_src>
import jax
import jax.numpy as jnp
from jax.experimental import pallas as pl
from jax.experimental.pallas import tpu as pltpu

BN_EPS = 1e-5
LEAKY_SLOPE = 0.2
_VMEM_BUDGET = 28 * 1024 * 1024  # conservative per-step working set (all gens)


def _round_up(v, m):
    return -(-v // m) * m


def _choose_tiles(B, in_units, out_units, vmem_budget=_VMEM_BUDGET):
    """Pick (TK, TN): lane-aligned, VMEM-budgeted, >=2 N tiles when possible."""
    out_128 = _round_up(out_units, 128)

    # N-tile candidates: full dim when too small to split into >=2 aligned
    # tiles, otherwise 128-multiples capped at half of out_128 so the
    # "parallel" grid axis always has >=2 tiles (v7x dual TensorCore).
    if out_128 < 256:
        tn_cands = [out_units]
    else:
        cap = max(128, (out_128 // 2) // 128 * 128)
        tn_cands = [t for t in (1024, 512, 256, 128) if t <= cap] or [128]

    # K-tile candidates: prefer collapsing the reduction entirely (grid K == 1,
    # x loaded once, no accumulation loop), otherwise 256-multiples.
    tk_cands = [in_units] + [t for t in (2048, 1024, 512, 256) if t < in_units]

    def cost(tk, tn):  # conservative f32, double-buffered working set
        return 2 * B * tk * 4 + 2 * tk * tn * 4 + 2 * B * tn * 4

    for tk in tk_cands:
        for tn in tn_cands:
            if cost(tk, tn) <= vmem_budget:
                return tk, tn
    return tk_cands[-1], tn_cands[-1]


def dense_kernel(x_ref, w_ref, gamma_ref, beta_ref, o_ref):
    # grid = (N tiles, K tiles); axis 1 is the innermost K reduction.
    k = pl.program_id(1)
    nk = pl.num_programs(1)

    # MXU matmul: bf16 operands (no-op cast if inputs are already bf16),
    # f32 accumulation directly into the resident output block.
    part = jnp.dot(x_ref[...].astype(jnp.bfloat16),
                   w_ref[...].astype(jnp.bfloat16),
                   preferred_element_type=jnp.float32)

    @pl.when(k == 0)
    def _():
        o_ref[...] = part

    @pl.when(k > 0)
    def _():
        o_ref[...] += part

    @pl.when(k == nk - 1)
    def _():
        y = o_ref[...]                                   # (B, TN) f32
        # BatchNorm1d (training mode, biased variance) over the full batch,
        # centered form for numerical stability.
        inv_b = 1.0 / y.shape[0]
        mean = jnp.sum(y, axis=0, keepdims=True) * inv_b
        centered = y - mean
        var = jnp.sum(centered * centered, axis=0, keepdims=True) * inv_b
        y_bn = gamma_ref[...] * (centered * jax.lax.rsqrt(var + BN_EPS)) \
            + beta_ref[...]
        # LeakyReLU(0.2) == max(y, 0.2*y) since slope < 1.
        o_ref[...] = jnp.maximum(y_bn, LEAKY_SLOPE * y_bn).astype(o_ref.dtype)


def dense_forward(x, w, b=None, gamma=None, beta=None, *, tn=None, tk=None):
    """LeakyReLU(BatchNorm1d_train(x @ w + b)); returns (B, out_units) f32.

    `b` is accepted for nn.Linear parity but is mathematically cancelled by
    the training-mode BatchNorm mean subtraction, so it never enters the
    kernel.
    """
    B, in_units = x.shape
    out_units = w.shape[1]
    if gamma is None:
        gamma = jnp.ones((out_units,), jnp.float32)
    if beta is None:
        beta = jnp.zeros((out_units,), jnp.float32)
    del b  # exactly cancelled by the BN mean subtraction

    TK, TN = _choose_tiles(B, in_units, out_units)
    if tk is not None:
        TK = tk
    if tn is not None:
        TN = tn

    in_p = in_units if TK == in_units else _round_up(in_units, TK)
    out_p = out_units if TN == out_units else _round_up(out_units, TN)

    # Pad only when the tiling requires it; fuse the unavoidable pad pass with
    # a bf16 cast (halves that tensor's HBM writeback + kernel read).
    x_in = x
    if in_p != in_units:
        x_in = jnp.pad(x, ((0, 0), (0, in_p - in_units))).astype(jnp.bfloat16)
    w_in = w
    if in_p != in_units or out_p != out_units:
        w_in = jnp.pad(w, ((0, in_p - in_units),
                           (0, out_p - out_units))).astype(jnp.bfloat16)
    g_in = jnp.pad(gamma.astype(jnp.float32), (0, out_p - out_units),
                   constant_values=1.0).reshape(1, out_p)
    be_in = jnp.pad(beta.astype(jnp.float32),
                    (0, out_p - out_units)).reshape(1, out_p)

    grid = (out_p // TN, in_p // TK)  # (N: parallel, K: reduction, innermost)

    out = pl.pallas_call(
        dense_kernel,
        out_shape=jax.ShapeDtypeStruct((B, out_p), jnp.float32),
        grid_spec=pltpu.PrefetchScalarGridSpec(
            num_scalar_prefetch=0,
            grid=grid,
            in_specs=[
                pl.BlockSpec((B, TK), lambda j, k: (0, k)),    # x
                pl.BlockSpec((TK, TN), lambda j, k: (k, j)),   # w
                pl.BlockSpec((1, TN), lambda j, k: (0, j)),    # gamma
                pl.BlockSpec((1, TN), lambda j, k: (0, j)),    # beta
            ],
            out_specs=pl.BlockSpec((B, TN), lambda j, k: (0, j)),
        ),
        compiler_params=pltpu.CompilerParams(
            dimension_semantics=("parallel", "arbitrary"),
            vmem_limit_bytes=40 * 1024 * 1024,
        ),
    )(x_in, w_in, g_in, be_in)

    if out_p != out_units:
        out = out[:, :out_units]
    return out


if __name__ == "__main__":
    key = jax.random.PRNGKey(0)

    def reference(x, w, b, gamma, beta):
        # Same math in plain JAX with bf16-rounded matmul operands (to match
        # the kernel's MXU dtype), training-mode BN, LeakyReLU(0.2).
        xq = x.astype(jnp.bfloat16).astype(jnp.float32)
        wq = w.astype(jnp.bfloat16).astype(jnp.float32)
        y = xq @ wq + b
        m = y.mean(axis=0, keepdims=True)
        v = ((y - m) ** 2).mean(axis=0, keepdims=True)
        y = gamma * (y - m) / jnp.sqrt(v + BN_EPS) + beta
        return jnp.where(y >= 0, y, LEAKY_SLOPE * y)

    def run_case(B, IN, OUT, *, tn=None, tk=None):
        ks = jax.random.split(jax.random.fold_in(key, B * 1000 + IN + OUT), 5)
        x = jax.random.normal(ks[0], (B, IN), dtype=jnp.float32)
        bound = 1.0 / float(IN) ** 0.5   # PyTorch nn.Linear-style init bound
        w = jax.random.uniform(ks[1], (IN, OUT), minval=-bound, maxval=bound,
                               dtype=jnp.float32)
        b = jax.random.uniform(ks[2], (OUT,), minval=-bound, maxval=bound,
                               dtype=jnp.float32)
        gamma = 1.0 + 0.1 * jax.random.normal(ks[3], (OUT,), dtype=jnp.float32)
        beta = 0.1 * jax.random.normal(ks[4], (OUT,), dtype=jnp.float32)

        out = jax.jit(lambda *a: dense_forward(*a, tn=tn, tk=tk))(
            x, w, b, gamma, beta)
        jax.block_until_ready(out)
        assert out.shape == (B, OUT)
        ref = reference(x, w, b, gamma, beta)
        err = float(jnp.max(jnp.abs(out - ref)))
        assert err < 2e-2, (B, IN, OUT, err)

    # Small shapes consistent with the module: batch=8, in_units=16, out=32.
    run_case(8, 16, 32)
    # Multi-tile "parallel" N axis (grid (3, 1)).
    run_case(16, 384, 384)
    # Explicit K-reduction tiling (grid (2, 2)) to exercise accumulation path.
    run_case(8, 256, 256, tk=128, tn=128)

    print("KERNEL_OK")
</pallas_src>

<mosaic_0001>
module attributes {stable_mosaic.version = 11 : i64} {
  func.func @dense_kernel(%arg0: i32, %arg1: i32, %arg2: memref<8x16xf32, #tpu.memory_space<vmem>>, %arg3: memref<16x32xf32, #tpu.memory_space<vmem>>, %arg4: memref<1x32xf32, #tpu.memory_space<vmem>>, %arg5: memref<1x32xf32, #tpu.memory_space<vmem>>, %arg6: memref<8x32xf32, #tpu.memory_space<vmem>>) attributes {dimension_semantics = [#tpu.dimension_semantics<parallel>, #tpu.dimension_semantics<arbitrary>], iteration_bounds = array<i64: 1, 1>, scalar_prefetch = 0 : i64, scratch_operands = 0 : i64, tpu.core_type = #tpu.core_type<tc>, window_params = [{transform_indices = @transform_0, window_bounds = array<i64: 8, 16>}, {transform_indices = @transform_1, window_bounds = array<i64: 16, 32>}, {transform_indices = @transform_2, window_bounds = array<i64: 1, 32>}, {transform_indices = @transform_3, window_bounds = array<i64: 1, 32>}, {transform_indices = @transform_4, window_bounds = array<i64: 8, 32>}]} {
    %c0 = arith.constant 0 : index
    %c0_0 = arith.constant 0 : index
    %0 = vector.load %arg2[%c0, %c0_0] : memref<8x16xf32, #tpu.memory_space<vmem>>, vector<8x16xf32>
    %1 = arith.truncf %0 : vector<8x16xf32> to vector<8x16xbf16>
    %c0_1 = arith.constant 0 : index
    %c0_2 = arith.constant 0 : index
    %2 = vector.load %arg3[%c0_1, %c0_2] : memref<16x32xf32, #tpu.memory_space<vmem>>, vector<16x32xf32>
    %3 = arith.truncf %2 : vector<16x32xf32> to vector<16x32xbf16>
    %cst = arith.constant dense<0.000000e+00> : vector<8x32xf32>
    %4 = tpu.matmul %1, %3, %cst {dimension_numbers = #tpu.dot_dimension_numbers<[1], [0], [0], [1], [0, 0, 1, 1], [], []>} : vector<8x16xbf16>, vector<16x32xbf16>, vector<8x32xf32> -> vector<8x32xf32>
    %c0_i32 = arith.constant 0 : i32
    %5 = arith.cmpi eq, %arg1, %c0_i32 : i32
    %6 = arith.extui %5 : i1 to i32
    %c0_i32_3 = arith.constant 0 : i32
    %7 = arith.cmpi ne, %6, %c0_i32_3 : i32
    scf.if %7 {
      %c0_8 = arith.constant 0 : index
      %c0_9 = arith.constant 0 : index
      %14 = vector.load %arg6[%c0_8, %c0_9] : memref<8x32xf32, #tpu.memory_space<vmem>>, vector<8x32xf32>
      tpu.vector_store %arg6[%c0_8, %c0_9], %4 {strides = array<i32>} : memref<8x32xf32, #tpu.memory_space<vmem>>, vector<8x32xf32>,
    } else {
    }
    %c0_i32_4 = arith.constant 0 : i32
    %8 = arith.cmpi sgt, %arg1, %c0_i32_4 : i32
    %9 = arith.extui %8 : i1 to i32
    %c0_i32_5 = arith.constant 0 : i32
    %10 = arith.cmpi ne, %9, %c0_i32_5 : i32
    scf.if %10 {
      %c0_8 = arith.constant 0 : index
      %c0_9 = arith.constant 0 : index
      %14 = vector.load %arg6[%c0_8, %c0_9] : memref<8x32xf32, #tpu.memory_space<vmem>>, vector<8x32xf32>
      %15 = arith.addf %14, %4 : vector<8x32xf32>
      %c0_10 = arith.constant 0 : index
      %c0_11 = arith.constant 0 : index
      %16 = vector.load %arg6[%c0_10, %c0_11] : memref<8x32xf32, #tpu.memory_space<vmem>>, vector<8x32xf32>
      tpu.vector_store %arg6[%c0_10, %c0_11], %15 {strides = array<i32>} : memref<8x32xf32, #tpu.memory_space<vmem>>, vector<8x32xf32>,
    } else {
    }
    %c0_i32_6 = arith.constant 0 : i32
    %11 = arith.cmpi eq, %arg1, %c0_i32_6 : i32
    %12 = arith.extui %11 : i1 to i32
    %c0_i32_7 = arith.constant 0 : i32
    %13 = arith.cmpi ne, %12, %c0_i32_7 : i32
    scf.if %13 {
      %c0_8 = arith.constant 0 : index
      %c0_9 = arith.constant 0 : index
      %14 = vector.load %arg6[%c0_8, %c0_9] : memref<8x32xf32, #tpu.memory_space<vmem>>, vector<8x32xf32>
      %cst_10 = arith.constant dense<0.000000e+00> : vector<32xf32>
      %15 = vector.multi_reduction <add>, %14, %cst_10 [0] : vector<8x32xf32> to vector<32xf32>
      %16 = vector.shape_cast %15 : vector<32xf32> to vector<1x32xf32>
      %cst_11 = arith.constant 1.250000e-01 : f32
      %17 = vector.broadcast %cst_11 : f32 to vector<1x32xf32>
      %18 = arith.mulf %16, %17 : vector<1x32xf32>
      %19 = vector.broadcast %18 : vector<1x32xf32> to vector<8x32xf32>
      %20 = arith.subf %14, %19 : vector<8x32xf32>
      %21 = arith.mulf %20, %20 : vector<8x32xf32>
      %cst_12 = arith.constant dense<0.000000e+00> : vector<32xf32>
      %22 = vector.multi_reduction <add>, %21, %cst_12 [0] : vector<8x32xf32> to vector<32xf32>
      %23 = vector.shape_cast %22 : vector<32xf32> to vector<1x32xf32>
      %cst_13 = arith.constant 1.250000e-01 : f32
      %24 = vector.broadcast %cst_13 : f32 to vector<1x32xf32>
      %25 = arith.mulf %23, %24 : vector<1x32xf32>
      %c0_14 = arith.constant 0 : index
      %c0_15 = arith.constant 0 : index
      %26 = vector.load %arg4[%c0_14, %c0_15] : memref<1x32xf32, #tpu.memory_space<vmem>>, vector<1x32xf32>
      %cst_16 = arith.constant 9.99999974E-6 : f32
      %27 = vector.broadcast %cst_16 : f32 to vector<1x32xf32>
      %28 = arith.addf %25, %27 : vector<1x32xf32>
      %29 = math.rsqrt %28 : vector<1x32xf32>
      %30 = vector.broadcast %29 : vector<1x32xf32> to vector<8x32xf32>
      %31 = arith.mulf %20, %30 : vector<8x32xf32>
      %32 = vector.broadcast %26 : vector<1x32xf32> to vector<8x32xf32>
      %33 = arith.mulf %32, %31 : vector<8x32xf32>
      %c0_17 = arith.constant 0 : index
      %c0_18 = arith.constant 0 : index
      %34 = vector.load %arg5[%c0_17, %c0_18] : memref<1x32xf32, #tpu.memory_space<vmem>>, vector<1x32xf32>
      %35 = vector.broadcast %34 : vector<1x32xf32> to vector<8x32xf32>
      %36 = arith.addf %33, %35 : vector<8x32xf32>
      %cst_19 = arith.constant 2.000000e-01 : f32
      %37 = vector.broadcast %cst_19 : f32 to vector<8x32xf32>
      %38 = arith.mulf %37, %36 : vector<8x32xf32>
      %39 = arith.maximumf %36, %38 : vector<8x32xf32>
      %c0_20 = arith.constant 0 : index
      %c0_21 = arith.constant 0 : index
      %40 = vector.load %arg6[%c0_20, %c0_21] : memref<8x32xf32, #tpu.memory_space<vmem>>, vector<8x32xf32>
      tpu.vector_store %arg6[%c0_20, %c0_21], %39 {strides = array<i32>} : memref<8x32xf32, #tpu.memory_space<vmem>>, vector<8x32xf32>,
    } else {
    }
    return
  }
  func.func @transform_0(%arg0: i32, %arg1: i32) -> (i32, i32) {
    %c0_i32 = arith.constant 0 : i32
    %c0_i32_0 = arith.constant 0 : i32
    return %c0_i32, %arg1 : i32, i32
  }
  func.func @transform_1(%arg0: i32, %arg1: i32) -> (i32, i32) {
    %c0_i32 = arith.constant 0 : i32
    return %arg1, %arg0 : i32, i32
  }
  func.func @transform_2(%arg0: i32, %arg1: i32) -> (i32, i32) {
    %c0_i32 = arith.constant 0 : i32
    %c0_i32_0 = arith.constant 0 : i32
    return %c0_i32, %arg0 : i32, i32
  }
  func.func @transform_3(%arg0: i32, %arg1: i32) -> (i32, i32) {
    %c0_i32 = arith.constant 0 : i32
    %c0_i32_0 = arith.constant 0 : i32
    return %c0_i32, %arg0 : i32, i32
  }
  func.func @transform_4(%arg0: i32, %arg1: i32) -> (i32, i32) {
    %c0_i32 = arith.constant 0 : i32
    %c0_i32_0 = arith.constant 0 : i32
    return %c0_i32, %arg0 : i32, i32
  }
}

</mosaic_0001>

<bundles_post_ra>
// kernel: _lambda_.1
= control target key start
LH: loop header
LB: loop body
LE: loop exit
PB: predicated region body
PF: predicated region fallthrough
CT: control target
= control target key end

     0   :  { %9 = vsyncpa [#allocation3], 0  ;;  %s346_s0 = inlined_call_operand.hbm [shape: f32[8,16], index: 0, kind: input, shape index: {}]   ;;  %s347_s1 = inlined_call_operand.hbm [shape: f32[16,32], index: 1, kind: input, shape index: {}]   ;;  %s348_s2 = inlined_call_operand.vmem [shape: f32[1,32], index: 2, kind: input, shape index: {}]   ;;  %s349_s3 = inlined_call_operand.vmem [shape: f32[1,32], index: 3, kind: input, shape index: {}]   ;;  %s350_s4 = inlined_call_operand.hbm [shape: f32[8,32], index: 4, kind: output, shape index: {}]  }
   0x1   :  { %10 = vsyncpa [#allocation6], 0 }
   0x2   :  { %11 = vsyncpa [#allocation4], 0  ;;  %s261_s15 = smov [#allocation2]   ;;  %s262_s17 = smov [#allocation5]  }
   0x3   :  { %s18_s16 = sshll.u32 %s261_s15, 4  ;;  %s27_s18 = sshll.u32 %s262_s17, 4  ;;  %s19_s16 = int_to_ptr.vmem [resolvable:$true] %s18_s16  ;;  %s293_s18 = int_to_ptr.vmem [resolvable:$true] %s27_s18 }
   0x4   :  { %s189_s21 = scalar_lea.hbm %s346_s0, 128 }
   0x5   :  { %p190_p0 = scmp.ne.s32.totalorder %s346_s0, %s189_s21  ;;  %p193_p1 = scmp.lt.u32.totalorder %s189_s21, %s346_s0 }
   0x7   :  { %p195_p2 = pnand %p193_p1, %p190_p0 }
   0x9   :  { %198 = shalt.err (!%p195_p2)
}
   0xa   :  { %s199_s26 = scalar_lea.vmem %s19_s16, 128  ;;  %p204_p4 = scmp.lt.s32.totalorder %s19_s16, %s19_s16 }
   0xb   :  { %p200_p3 = scmp.ne.s32.totalorder %s19_s16, %s199_s26  ;;  %p205_p5 = scmp.lt.s32.totalorder %s199_s26, %s199_s26 }
   0xd   :  { %p206_p6 = por %p205_p5, %p204_p4 }
   0xf   :  { %p207_p7 = pnand %p206_p6, %p200_p3 }
  0x11   :  { %210 = shalt.err (!%p207_p7)
}
  0x12   :  { %21 = dma.hbm_to_vmem [thread:$0]  %s346_s0, 128, %s19_s16, [#allocation3]  }
  0x13   :  { %s211_s5 = scalar_lea.hbm %s347_s1, 256 }
  0x14   :  { %p212_p8 = scmp.ne.s32.totalorder %s347_s1, %s211_s5  ;;  %p215_p9 = scmp.lt.u32.totalorder %s211_s5, %s347_s1 }
  0x16   :  { %p217_p10 = pnand %p215_p9, %p212_p8 }
  0x18   :  { %220 = shalt.err (!%p217_p10)
}
  0x19   :  { %s221_s10 = scalar_lea.vmem %s293_s18, 256  ;;  %p226_p12 = scmp.lt.s32.totalorder %s293_s18, %s293_s18 }
  0x1a   :  { %p222_p11 = scmp.ne.s32.totalorder %s293_s18, %s221_s10  ;;  %p227_p13 = scmp.lt.s32.totalorder %s221_s10, %s221_s10 }
  0x1c   :  { %p228_p0 = por %p227_p13, %p226_p12 }
  0x1e   :  { %p229_p1 = pnand %p228_p0, %p222_p11 }
  0x20   :  { %232 = shalt.err (!%p229_p1)
}
  0x21   :  { %s263_s0 = smov 128   ;;  %s264_s11 = smov 8  }
  0x22   :  { %33 = dma.hbm_to_vmem [thread:$0]  %s347_s1, 256, %s293_s18, [#allocation6], %s263_s0, %s263_s0, %s264_s11  }
  0x23   :  { %255 = dma.done.wait [#allocation3], 128  }
  0x24   :  { %256 = vsyncadd [#allocation3], 4294967168 }
  0x25   :  { %257 = dma.done.wait [#allocation6], 256  }
  0x26   :  { %258 = vsyncadd [#allocation6], 4294967040  ;;  %v265_v0 = vmov 0.0   ;;  %vm266_vm0 = vmmov 0   ;;  %v47_v1 = vld [vmem:[#allocation5] sm:$0xff]  ;;  %v48_v2 = vld [vmem:[#allocation5 + $0x8] sm:$0xff] }
  0x27   :  { %174 = vmatprep.subr.bf16.mxu0 %v265_v0  ;;  %176 = vmatprep.mubr.msk.bf16.mxu0 %vm266_vm0, %v265_v0  ;;  %v45_v3 = vld [vmem:[#allocation2] sm:$0xff]  ;;  %v49_v4 = vpack.c.bf16 %v48_v2, %v47_v1  ;;  %vm50_vm1 = vcmask 130048   ;;  %vm98_vm2 = vcmask 261120   ;;  %s267_s17 = smov [#allocation7]  }
  0x28   :  { %v46_v5 = vpack.c.bf16 %v45_v3, %v45_v3  ;;  %v170_v31 = vld [vmem:[%s348_s2] ss:$0 sm:$0xff]  ;;  %s159_s18 = sshll.u32 %s267_s17, 4  ;;  %s160_s18 = int_to_ptr.vmem [resolvable:$true] %s159_s18 }
  0x29   :  { %175 = vmatpush3.bf16.msra.mxu0 %v49_v4  ;;  %v171_v33 = vld [vmem:[%s349_s3] ss:$0 sm:$0xff]  ;;  %s233_s19 = scalar_lea.vmem %s160_s18, 128  ;;  %p238_p3 = scmp.lt.s32.totalorder %s160_s18, %s160_s18 }
  0x2a   :  { %p234_p2 = scmp.ne.s32.totalorder %s160_s18, %s233_s19  ;;  %p239_p4 = scmp.lt.s32.totalorder %s233_s19, %s233_s19 }
  0x2c   :  { %177 = vmatmul.mubr.msk.bf16.vlgmr.msra.gmra.mrb[0].mxu0 %vm50_vm1, %v46_v5  ;;  %p240_p5 = por %p239_p4, %p238_p3 }
  0x2e   :  { %p241_p6 = pnand %p240_p5, %p234_p2 }
  0xff   :  { %v88_v6 = vpop.f32.mrb[0].mxu0 }
 0x100   :  { %99 = vst.msk [vmem:[#allocation7] sm:$0xff] %vm98_vm2, %v88_v6  ;;  %v178_v7 = vpop.f32.mrb[1].mxu0 }
 0x101   :  { %v91_v8 = vpop.f32.mrb[2].mxu0 }
 0x102   :  { %v179_v9 = vpop.f32.mrb[3].mxu0 }
 0x107   :  { %v111_v10 = vld [vmem:[#allocation7] sm:$0xff] }
 0x108   :  { %v113_v11 = vsel %vm98_vm2, %v111_v10, 0.0 }
 0x109   :  { %v114_v12 = vrot.slane %v113_v11, 4 }
 0x10b   :  { %v115_v13 = vadd.f32 %v114_v12, %v113_v11 }
 0x10d   :  { %v116_v14 = vrot.slane %v115_v13, 2 }
 0x10f   :  { %v117_v15 = vadd.f32 %v116_v14, %v115_v13 }
 0x111   :  { %v118_v16 = vrot.slane %v117_v15, 1 }
 0x113   :  { %v119_v17 = vadd.f32 %v118_v16, %v117_v15 }
 0x115   :  { %v120_v18 = vmul.f32 0.125, %v119_v17 }
 0x117   :  { %v121_v19 = vsub.f32 %v111_v10, %v120_v18 }
 0x119   :  { %v122_v20 = vmul.f32 %v121_v19, %v121_v19 }
 0x11b   :  { %v123_v21 = vsel %vm98_vm2, %v122_v20, 0.0 }
 0x11c   :  { %v124_v22 = vrot.slane %v123_v21, 4 }
 0x11e   :  { %v125_v23 = vadd.f32 %v124_v22, %v123_v21 }
 0x120   :  { %v126_v24 = vrot.slane %v125_v23, 2 }
 0x122   :  { %v127_v25 = vadd.f32 %v126_v24, %v125_v23 }
 0x124   :  { %v128_v26 = vrot.slane %v127_v25, 1 }
 0x126   :  { %v129_v27 = vadd.f32 %v128_v26, %v127_v25 }
 0x128   :  { %v130_v28 = vmul.f32 0.125, %v129_v27 }
 0x12a   :  { %v132_v29 = vadd.f32 1e-05, %v130_v28 }
 0x12c   :  { %187 = vrsqrt.f32 %v132_v29 }
 0x136   :  { %v188_v30 = vpop.eup %187 }
 0x137   :  { %v134_v32 = vmul.f32 %v188_v30, %v121_v19 }
 0x139   :  { %v141_v34 = vmul.f32 %v170_v31, %v134_v32 }
 0x13b   :  { %v149_v35 = vadd.f32 %v171_v33, %v141_v34 }
 0x13d   :  { %v150_v36 = vmul.f32 0.2, %v149_v35 }
 0x13f   :  { %v151_v37 = vmax.f32 %v149_v35, %v150_v36 }
 0x141   :  { %152 = vst.msk [vmem:[#allocation7] sm:$0xff] %vm98_vm2, %v151_v37 }
 0x142   :  { %244 = shalt.err (!%p241_p6)
}
 0x143   :  { %s245_s3 = scalar_lea.hbm %s350_s4, 128 }
 0x144   :  { %p246_p7 = scmp.ne.s32.totalorder %s350_s4, %s245_s3  ;;  %p249_p8 = scmp.lt.u32.totalorder %s245_s3, %s350_s4 }
 0x146   :  { %p251_p9 = pnand %p249_p8, %p246_p7 }
 0x148   :  { %254 = shalt.err (!%p251_p9)
}
 0x149   :  { %162 = dma.vmem_to_hbm [thread:$0]  %s160_s18, 128, %s350_s4, [#allocation4]  }
 0x14a   :  { %259 = dma.done.wait [#allocation4], 128  }
 0x14b   :  { %260 = vsyncadd [#allocation4], 4294967168 }
 0x14c   :  { %166 = vsyncpa [#allocation3], 1 }
 0x14d   :  { %167 = vsyncpa [#allocation6], 1 }
 0x14e   :  { %168 = vsyncpa [#allocation4], 1 }

</bundles_post_ra>
